<compile_context>
chip_gen: v5e
topology: v5e:2x2
jax: 0.10.0
libtpu: 0.0.40
codegen_flags: <defaults>
</compile_context>

<pallas_src>
import math

import jax
import jax.numpy as jnp
from jax.experimental import pallas as pl
from jax.experimental.pallas import tpu as pltpu

_LANE = 128      # vreg lane width
_SUBLANE = 8     # 32-bit sublane pack


def _encoder_kernel(x_ref, o_ref):
    # x_ref: (rows, hw_tile)            input spatial tile
    # o_ref: (t_inner*rows, hw_tile)    t_inner time replicas of that tile,
    #                                   packed contiguously along sublanes
    rows = x_ref.shape[0]
    t_total = o_ref.shape[0] // rows
    # Smallest run of time slices whose row count is a multiple of the 8-row
    # sublane pack -> every interior store is a dense, unmasked vst.
    t_unit = _SUBLANE // math.gcd(rows, _SUBLANE)

    if t_unit == 1:
        # Sublane-aligned rows: one dense row-block store per time step.
        # Re-reading x_ref from VMEM each step keeps live vregs to ~one slice
        # (3 vld slots/cycle hide easily behind the 1-2 vst slots that bound
        # this loop), so no spills even for large tiles.
        for t in range(t_total):
            o_ref[pl.ds(t * rows, rows), :] = x_ref[...]
    else:
        # rows not a multiple of 8 (e.g. B=1, C=3): store sublane-aligned runs
        # of t_unit replicas; temp holds at most 8 time slices of one tile.
        run = jnp.tile(x_ref[...], (t_unit, 1))
        run_rows = t_unit * rows
        n_runs = t_total // t_unit
        for r in range(n_runs):
            o_ref[pl.ds(r * run_rows, run_rows), :] = run
        rem = t_total - n_runs * t_unit
        if rem:  # ragged tail (only when T is not run-aligned); masked store
            o_ref[pl.ds(n_runs * run_rows, rem * rows), :] = run[: rem * rows]


def _vmem_capacity_bytes() -> int:
    """Per-core physical VMEM; conservative fallback if the query is unavailable."""
    try:
        return int(pltpu.get_tpu_info().vmem_capacity_bytes)
    except Exception:
        return 64 << 20  # v7x physical ceiling (smallest of v5e/v6e/v7x)


def _choose_tiling(num_steps: int, rows: int, hw: int, itemsize: int,
                   budget: int) -> tuple[int, int]:
    """Pick (t_inner, hw_tile): time slices per output block and a lane-dense
    spatial tile such that double-buffered input + output blocks fit `budget`."""
    t_unit = _SUBLANE // math.gcd(rows, _SUBLANE)

    def max_cols(t_inner: int) -> int:
        # double-buffered input block + double-buffered output block
        per_col = itemsize * rows * 2 * (1 + t_inner)
        return budget // per_col

    # Prefer collapsing all T into one output block (single store burst per
    # spatial tile); only shrink the T block when that would squeeze the
    # spatial tile below ~512 lanes (~85% of HBM roofline measured).
    t_inner = num_steps
    target_cols = min(hw, 4 * _LANE)
    while t_inner > t_unit and max_cols(t_inner) < target_cols:
        t_inner = max(((t_inner // 2) // t_unit) * t_unit, t_unit)

    cols = max_cols(t_inner)
    if cols >= hw:
        hw_tile = hw                        # whole spatial axis per grid step
    elif cols >= _LANE:
        hw_tile = (cols // _LANE) * _LANE   # largest lane-dense tile in budget
    else:
        # Degenerate: even one time slice at 128 lanes overflows the budget
        # (enormous B*C).  Use the minimum lane-dense tile and rely on the
        # explicit vmem_limit headroom.
        # TODO(synk): tile the row (B*C) axis as well if this ever triggers.
        hw_tile = min(hw, _LANE)
        t_inner = min(num_steps, t_unit)
    return t_inner, hw_tile


def encoder_forward(x: jax.Array, num_steps: int) -> jax.Array:
    """Replicates x [B, C, H, W] across time -> [T, B, C, H, W] via Pallas."""
    B, C, H, W = x.shape
    rows, hw = B * C, H * W
    itemsize = x.dtype.itemsize
    x2d = x.reshape(rows, hw)

    capacity = _vmem_capacity_bytes()
    budget = min(capacity // 4, 24 << 20)   # 24 MiB on v5e/v6e, 16 MiB on v7x
    t_inner, hw_tile = _choose_tiling(num_steps, rows, hw, itemsize, budget)

    # v7x has 2 TensorCores: guarantee >= 2 "parallel" grid steps when the
    # problem is big enough that per-step write DMA (>~1 us) hides the extra
    # ~0.35 us grid-step overhead.  Tiny problems stay at a single step.
    out_bytes = num_steps * rows * hw * itemsize
    if (pl.cdiv(hw, hw_tile) * pl.cdiv(num_steps, t_inner) == 1
            and out_bytes >= (2 << 20)):
        if hw >= 2 * _LANE:
            hw_tile = max(_LANE, (pl.cdiv(hw, 2) // _LANE) * _LANE)
        else:
            t_unit = _SUBLANE // math.gcd(rows, _SUBLANE)
            half = (pl.cdiv(num_steps, 2) // t_unit) * t_unit
            if 0 < half < num_steps:
                t_inner = half

    j_tiles = pl.cdiv(hw, hw_tile)
    t_tiles = pl.cdiv(num_steps, t_inner)

    # Working set actually held per grid step (input + output, double-buffered)
    in_block = rows * hw_tile * itemsize
    out_block = t_inner * rows * hw_tile * itemsize
    working_set = 2 * (in_block + out_block)
    vmem_limit = int(min(max(working_set * 5 // 4 + (2 << 20), 16 << 20),
                         capacity))

    # Output is the 2-D flattening (T*rows, hw) of (T, B, C, H, W): identical
    # HBM layout, but time replicas pack densely along sublanes.
    out2d = pl.pallas_call(
        _encoder_kernel,
        out_shape=jax.ShapeDtypeStruct((num_steps * rows, hw), x.dtype),
        grid_spec=pltpu.PrefetchScalarGridSpec(
            num_scalar_prefetch=0,
            # t is the innermost grid axis; the input index_map ignores it, so
            # the input block is NOT re-DMA'd across consecutive t steps.
            grid=(j_tiles, t_tiles),
            in_specs=[
                pl.BlockSpec((rows, hw_tile), lambda j, t: (0, j)),
            ],
            out_specs=pl.BlockSpec(
                (t_inner * rows, hw_tile), lambda j, t: (t, j)
            ),
        ),
        compiler_params=pltpu.CompilerParams(
            # Disjoint output slices per grid step -> shardable across the two
            # TensorCores on v7x; no-op on v5e/v6e.
            dimension_semantics=("parallel", "parallel"),
            vmem_limit_bytes=vmem_limit,
        ),
    )(x2d)

    return out2d.reshape(num_steps, B, C, H, W)


if __name__ == "__main__":
    num_steps = 8
    B, C, H, W = 2, 4, 16, 16

    key = jax.random.PRNGKey(0)
    x = jax.random.normal(key, (B, C, H, W), dtype=jnp.float32)

    out = encoder_forward(x, num_steps)
    out = jax.block_until_ready(out)

    # sanity checks against the module's documented semantics
    assert out.shape == (num_steps, B, C, H, W), out.shape
    ref = jnp.broadcast_to(x[None], (num_steps, B, C, H, W))
    assert jnp.array_equal(out, ref)

    print("KERNEL_OK")
</pallas_src>

<mosaic_0001>
module attributes {stable_mosaic.version = 11 : i64} {
  func.func @_encoder_kernel(%arg0: i32, %arg1: i32, %arg2: memref<8x256xf32, #tpu.memory_space<vmem>>, %arg3: memref<64x256xf32, #tpu.memory_space<vmem>>) attributes {dimension_semantics = [#tpu.dimension_semantics<parallel>, #tpu.dimension_semantics<parallel>], iteration_bounds = array<i64: 1, 1>, scalar_prefetch = 0 : i64, scratch_operands = 0 : i64, tpu.core_type = #tpu.core_type<tc>, window_params = [{transform_indices = @transform_0, window_bounds = array<i64: 8, 256>}, {transform_indices = @transform_1, window_bounds = array<i64: 64, 256>}]} {
    %c0 = arith.constant 0 : index
    %c0_0 = arith.constant 0 : index
    %0 = vector.load %arg2[%c0, %c0_0] : memref<8x256xf32, #tpu.memory_space<vmem>>, vector<8x256xf32>
    %c0_1 = arith.constant 0 : index
    %c0_2 = arith.constant 0 : index
    %1 = vector.load %arg3[%c0_1, %c0_2] : memref<64x256xf32, #tpu.memory_space<vmem>>, vector<8x256xf32>
    tpu.vector_store %arg3[%c0_1, %c0_2], %0 {strides = array<i32>} : memref<64x256xf32, #tpu.memory_space<vmem>>, vector<8x256xf32>,
    %c0_3 = arith.constant 0 : index
    %c0_4 = arith.constant 0 : index
    %2 = vector.load %arg2[%c0_3, %c0_4] : memref<8x256xf32, #tpu.memory_space<vmem>>, vector<8x256xf32>
    %c8 = arith.constant 8 : index
    %c0_5 = arith.constant 0 : index
    %3 = vector.load %arg3[%c8, %c0_5] : memref<64x256xf32, #tpu.memory_space<vmem>>, vector<8x256xf32>
    tpu.vector_store %arg3[%c8, %c0_5], %2 {strides = array<i32>} : memref<64x256xf32, #tpu.memory_space<vmem>>, vector<8x256xf32>,
    %c0_6 = arith.constant 0 : index
    %c0_7 = arith.constant 0 : index
    %4 = vector.load %arg2[%c0_6, %c0_7] : memref<8x256xf32, #tpu.memory_space<vmem>>, vector<8x256xf32>
    %c16 = arith.constant 16 : index
    %c0_8 = arith.constant 0 : index
    %5 = vector.load %arg3[%c16, %c0_8] : memref<64x256xf32, #tpu.memory_space<vmem>>, vector<8x256xf32>
    tpu.vector_store %arg3[%c16, %c0_8], %4 {strides = array<i32>} : memref<64x256xf32, #tpu.memory_space<vmem>>, vector<8x256xf32>,
    %c0_9 = arith.constant 0 : index
    %c0_10 = arith.constant 0 : index
    %6 = vector.load %arg2[%c0_9, %c0_10] : memref<8x256xf32, #tpu.memory_space<vmem>>, vector<8x256xf32>
    %c24 = arith.constant 24 : index
    %c0_11 = arith.constant 0 : index
    %7 = vector.load %arg3[%c24, %c0_11] : memref<64x256xf32, #tpu.memory_space<vmem>>, vector<8x256xf32>
    tpu.vector_store %arg3[%c24, %c0_11], %6 {strides = array<i32>} : memref<64x256xf32, #tpu.memory_space<vmem>>, vector<8x256xf32>,
    %c0_12 = arith.constant 0 : index
    %c0_13 = arith.constant 0 : index
    %8 = vector.load %arg2[%c0_12, %c0_13] : memref<8x256xf32, #tpu.memory_space<vmem>>, vector<8x256xf32>
    %c32 = arith.constant 32 : index
    %c0_14 = arith.constant 0 : index
    %9 = vector.load %arg3[%c32, %c0_14] : memref<64x256xf32, #tpu.memory_space<vmem>>, vector<8x256xf32>
    tpu.vector_store %arg3[%c32, %c0_14], %8 {strides = array<i32>} : memref<64x256xf32, #tpu.memory_space<vmem>>, vector<8x256xf32>,
    %c0_15 = arith.constant 0 : index
    %c0_16 = arith.constant 0 : index
    %10 = vector.load %arg2[%c0_15, %c0_16] : memref<8x256xf32, #tpu.memory_space<vmem>>, vector<8x256xf32>
    %c40 = arith.constant 40 : index
    %c0_17 = arith.constant 0 : index
    %11 = vector.load %arg3[%c40, %c0_17] : memref<64x256xf32, #tpu.memory_space<vmem>>, vector<8x256xf32>
    tpu.vector_store %arg3[%c40, %c0_17], %10 {strides = array<i32>} : memref<64x256xf32, #tpu.memory_space<vmem>>, vector<8x256xf32>,
    %c0_18 = arith.constant 0 : index
    %c0_19 = arith.constant 0 : index
    %12 = vector.load %arg2[%c0_18, %c0_19] : memref<8x256xf32, #tpu.memory_space<vmem>>, vector<8x256xf32>
    %c48 = arith.constant 48 : index
    %c0_20 = arith.constant 0 : index
    %13 = vector.load %arg3[%c48, %c0_20] : memref<64x256xf32, #tpu.memory_space<vmem>>, vector<8x256xf32>
    tpu.vector_store %arg3[%c48, %c0_20], %12 {strides = array<i32>} : memref<64x256xf32, #tpu.memory_space<vmem>>, vector<8x256xf32>,
    %c0_21 = arith.constant 0 : index
    %c0_22 = arith.constant 0 : index
    %14 = vector.load %arg2[%c0_21, %c0_22] : memref<8x256xf32, #tpu.memory_space<vmem>>, vector<8x256xf32>
    %c56 = arith.constant 56 : index
    %c0_23 = arith.constant 0 : index
    %15 = vector.load %arg3[%c56, %c0_23] : memref<64x256xf32, #tpu.memory_space<vmem>>, vector<8x256xf32>
    tpu.vector_store %arg3[%c56, %c0_23], %14 {strides = array<i32>} : memref<64x256xf32, #tpu.memory_space<vmem>>, vector<8x256xf32>,
    return
  }
  func.func @transform_0(%arg0: i32, %arg1: i32) -> (i32, i32) {
    %c0_i32 = arith.constant 0 : i32
    %c0_i32_0 = arith.constant 0 : i32
    return %c0_i32, %arg0 : i32, i32
  }
  func.func @transform_1(%arg0: i32, %arg1: i32) -> (i32, i32) {
    %c0_i32 = arith.constant 0 : i32
    return %arg1, %arg0 : i32, i32
  }
}

</mosaic_0001>

<bundles_post_ra>
// kernel: tpu_custom_call.1
= control target key start
LH: loop header
LB: loop body
LE: loop exit
PB: predicated region body
PF: predicated region fallthrough
CT: control target
= control target key end

     0   :  { %6 = vsyncpa [#allocation3], 0  ;;  %s150_s0 = inlined_call_operand.hbm [shape: f32[8,256], index: 0, kind: input, shape index: {}]   ;;  %s151_s1 = inlined_call_operand.hbm [shape: f32[64,256], index: 1, kind: output, shape index: {}]  }
   0x1   :  { %7 = vsyncpa [#allocation4], 0  ;;  %s13_s8 = sshll.u32 %s150_s0, 4  ;;  %s130_s9 = smov [#allocation2]   ;;  %s14_s8 = int_to_ptr.hbm [resolvable:$true] %s13_s8 }
   0x2   :  { %s15_s10 = sshll.u32 %s130_s9, 4  ;;  %s16_s10 = int_to_ptr.vmem [resolvable:$true] %s15_s10 }
   0x3   :  { %18 = dma.hbm_to_vmem [thread:$0]  %s14_s8, 256, %s16_s10, [#allocation3]  }
   0x4   :  { %126 = dma.done.wait [#allocation3], 256  }
   0x5   :  { %127 = vsyncadd [#allocation3], 4294967040  ;;  %v23_v0 = vld [vmem:[#allocation2] sm:$0xff]  ;;  %v24_v1 = vld [vmem:[#allocation2 + $0x8] sm:$0xff]  ;;  %s131_s0 = smov [#allocation5]   ;;  %s61_s14 = sshll.u32 %s151_s1, 4  ;;  %s62_s14 = int_to_ptr.hbm [resolvable:$true] %s61_s14 }
   0x6   :  { %25 = vst [vmem:[#allocation5] sm:$0xff] %v23_v0  ;;  %s59_s11 = sshll.u32 %s131_s0, 4  ;;  %s132_s15 = smov 256   ;;  %s60_s11 = int_to_ptr.vmem [resolvable:$true] %s59_s11 }
   0x7   :  { %26 = vst [vmem:[#allocation5 + $0x8] sm:$0xff] %v24_v1  ;;  %s133_s16 = smov 16  }
   0x8   :  { %29 = vst [vmem:[#allocation5 + $0x10] sm:$0xff] %v23_v0 }
   0x9   :  { %30 = vst [vmem:[#allocation5 + $0x18] sm:$0xff] %v24_v1 }
   0xa   :  { %33 = vst [vmem:[#allocation5 + $0x20] sm:$0xff] %v23_v0 }
   0xb   :  { %34 = vst [vmem:[#allocation5 + $0x28] sm:$0xff] %v24_v1 }
   0xc   :  { %37 = vst [vmem:[#allocation5 + $0x30] sm:$0xff] %v23_v0 }
   0xd   :  { %38 = vst [vmem:[#allocation5 + $0x38] sm:$0xff] %v24_v1 }
   0xe   :  { %41 = vst [vmem:[#allocation5 + $0x40] sm:$0xff] %v23_v0 }
   0xf   :  { %42 = vst [vmem:[#allocation5 + $0x48] sm:$0xff] %v24_v1 }
  0x10   :  { %45 = vst [vmem:[#allocation5 + $0x50] sm:$0xff] %v23_v0 }
  0x11   :  { %46 = vst [vmem:[#allocation5 + $0x58] sm:$0xff] %v24_v1 }
  0x12   :  { %49 = vst [vmem:[#allocation5 + $0x60] sm:$0xff] %v23_v0 }
  0x13   :  { %50 = vst [vmem:[#allocation5 + $0x68] sm:$0xff] %v24_v1 }
  0x14   :  { %53 = vst [vmem:[#allocation5 + $0x70] sm:$0xff] %v23_v0 }
  0x15   :  { %54 = vst [vmem:[#allocation5 + $0x78] sm:$0xff] %v24_v1 }
  0x16   :  { %67 = dma.vmem_to_hbm [thread:$0]  %s60_s11, 2048, %s62_s14, [#allocation4], %s132_s15, %s132_s15, %s133_s16  }
  0x17   :  { %128 = dma.done.wait [#allocation4], 2048  }
  0x18   :  { %129 = vsyncadd [#allocation4], 4294965248 }
  0x19   :  { %72 = vsyncpa [#allocation3], 1 }
  0x1a   :  { %73 = vsyncpa [#allocation4], 1 }

</bundles_post_ra>
